<compile_context>
chip_gen: v5e
topology: v5e:2x2
jax: 0.10.0
libtpu: 0.0.40
codegen_flags: <defaults>
</compile_context>

<pallas_src>
import jax
import jax.numpy as jnp
from jax.experimental import pallas as pl
from jax.experimental.pallas import tpu as pltpu


def _identity_dma_kernel(mem_hbm, out_hbm, sem):
    # One whole-array HBM->HBM DMA; semantically `out = memory`.
    copy = pltpu.make_async_copy(mem_hbm, out_hbm, sem)
    copy.start()
    copy.wait()


def dummy_decoder_forward(tgt, memory, tgt_mask=None, memory_mask=None,
                          tgt_key_padding_mask=None,
                          memory_key_padding_mask=None):
    """Pallas implementation of DummyDecoder.forward: returns `memory`.

    All other arguments are accepted (to mirror the PyTorch signature) and
    ignored, exactly as in the reference module.

    NOTE(perf): in a real model, simply `return memory` here -- that is the
    only implementation that beats the roofline (zero HBM traffic).  The
    pallas_call below exists so a device op is present; it is a single direct
    HBM->HBM DMA so it costs exactly one read + one write of `memory` and
    nothing else (no VMEM staging, no grid-step overhead).
    """
    nbytes = memory.size * memory.dtype.itemsize
    return pl.pallas_call(
        _identity_dma_kernel,
        out_shape=jax.ShapeDtypeStruct(memory.shape, memory.dtype),
        in_specs=[pl.BlockSpec(memory_space=pl.ANY)],
        out_specs=pl.BlockSpec(memory_space=pl.ANY),
        scratch_shapes=[pltpu.SemaphoreType.DMA(())],
        compiler_params=pltpu.CompilerParams(has_side_effects=True),
        cost_estimate=pl.CostEstimate(
            flops=0, transcendentals=0, bytes_accessed=2 * nbytes),
    )(memory)


if __name__ == "__main__":
    key = jax.random.PRNGKey(0)
    k_tgt, k_mem = jax.random.split(key)

    seq_len, batch, d_model = 8, 2, 32

    # Inputs mirroring the PyTorch forward signature.
    tgt = jax.random.normal(k_tgt, (seq_len, batch, d_model), dtype=jnp.float32)
    memory = jax.random.normal(k_mem, (seq_len, batch, d_model), dtype=jnp.float32)
    tgt_mask = jnp.zeros((seq_len, seq_len), dtype=jnp.float32)
    memory_mask = jnp.zeros((seq_len, seq_len), dtype=jnp.float32)
    tgt_key_padding_mask = jnp.zeros((batch, seq_len), dtype=bool)
    memory_key_padding_mask = jnp.zeros((batch, seq_len), dtype=bool)

    out = dummy_decoder_forward(
        tgt, memory, tgt_mask, memory_mask,
        tgt_key_padding_mask, memory_key_padding_mask,
    )
    out = jax.block_until_ready(out)

    # Verify exact identity semantics (shape, dtype, values).
    assert out.shape == memory.shape
    assert out.dtype == memory.dtype
    assert bool(jnp.array_equal(out, memory))

    print("KERNEL_OK")
</pallas_src>

<mosaic_0001>
module attributes {stable_mosaic.version = 11 : i64} {
  func.func @_identity_dma_kernel(%arg0: memref<8x2x32xf32, #tpu.memory_space<any>>, %arg1: memref<8x2x32xf32, #tpu.memory_space<any>>, %arg2: memref<!tpu.dma_semaphore, #tpu.memory_space<semaphore_mem>>) attributes {dimension_semantics = [], scalar_prefetch = 0 : i64, scratch_operands = 1 : i64, tpu.core_type = #tpu.core_type<tc>} {
    tpu.enqueue_dma source(%arg0 : memref<8x2x32xf32, #tpu.memory_space<any>>) target(%arg1 : memref<8x2x32xf32, #tpu.memory_space<any>>) target_semaphore(%arg2 : memref<!tpu.dma_semaphore, #tpu.memory_space<semaphore_mem>>)
    tpu.wait_dma2 semaphore(%arg2 : memref<!tpu.dma_semaphore, #tpu.memory_space<semaphore_mem>>) src(%arg0 : memref<8x2x32xf32, #tpu.memory_space<any>>) dst(%arg1 : memref<8x2x32xf32, #tpu.memory_space<any>>)
    return
  }
}

</mosaic_0001>

<bundles_post_ra>
// kernel: tpu_custom_call.1
= control target key start
LH: loop header
LB: loop body
LE: loop exit
PB: predicated region body
PF: predicated region fallthrough
CT: control target
= control target key end

     0   :  { %s33_s12 = smov [#allocation2]   ;;  %s34_s13 = smov [#allocation3]   ;;  %s52_s0 = inlined_call_operand.hbm [shape: f32[8,2,32], index: 0, kind: input, shape index: {}]   ;;  %s53_s1 = inlined_call_operand.hbm [shape: f32[8,2,32], index: 1, kind: output, shape index: {}]  }
   0x1   :  { %s10_s8 = sshll.u32 %s52_s0, 4  ;;  %s12_s11 = sshll.u32 %s53_s1, 4  ;;  %s11_s8 = int_to_ptr.hbm [resolvable:$true] %s10_s8  ;;  %s13_s11 = int_to_ptr.hbm [resolvable:$true] %s12_s11 }
   0x2   :  { %s35_s14 = smov 0  }
   0x3   :  { %16 = dma.general %s11_s8, 256, %s13_s11, %s33_s12, %s34_s13, [#allocation4], %s35_s14, 0  }
   0x4   :  { %31 = dma.done.wait [#allocation2], 256 }
   0x5   :  { %32 = vsyncadd [#allocation2], 4294967040 }
   0x6   :  { %21 = vsyncmov [#allocation2] }
   0x9   :  { %s22_s15 = vpop.sfrf %21 }
   0xa   :  { %p27_p0 = scmp.ne.s32.totalorder %s22_s15, 0 }
   0xc   :  { %26 = shalt.err (%p27_p0)  }

</bundles_post_ra>
